<compile_context>
chip_gen: v7x
topology: tpu7x:2x2x1
jax: 0.10.0
libtpu: 0.0.40
codegen_flags: <defaults>
</compile_context>

<pallas_src>
import functools

import jax
import jax.numpy as jnp
from jax.experimental import pallas as pl
from jax.experimental.pallas import tpu as pltpu

MIN_DIST = 1e-6
RBF_GAMMA = 10.0


def _round_up(x, m):
    return ((x + m - 1) // m) * m


def _coordgen_pair_kernel(cutoff2, mind2, gamma, ti, tj,
                          cpi_ref, gidi_ref, ni_ref, ai_ref, ci_ref,
                          cpjT_ref, gidj_ref, nj_ref, bj_ref,
                          mus_ref, wrbf_ref, bbb_ref, ws1e_ref, bs1_ref,
                          ws2_ref, bs2_ref,
                          scores_ref):
    """One (i-tile, j-tile) step of the dense radius-graph message pass.

    i-tile nodes are message receivers, j-tile nodes are sources.  The
    geometric / mask stage is lane-dense [ti, tj]; the per-pair feature stage
    is [ti*tj, F] with F on lanes for the MXU.  scores_ref is resident across
    the j (reduction) grid axis and accumulates the masked segment-sum.
    """
    j_step = pl.program_id(1)

    cpi = cpi_ref[...]                                 # [ti, 3]  f32
    cpjT = cpjT_ref[...]                               # [3, tj]  f32 (pre-transposed)

    # ---- pairwise squared distances + radius mask, lane-dense [ti, tj] ------
    # ||xi - xj||^2 = |xi|^2 + |xj|^2 - 2 xi.xj.  The cross term stays on the
    # VPU (contraction dim is only 3, MXU not worth it); |x|^2 are hoisted.
    cross = (cpi[:, 0:1] * cpjT[0:1, :]
             + cpi[:, 1:2] * cpjT[1:2, :]
             + cpi[:, 2:3] * cpjT[2:3, :])             # [ti, tj]
    dist2 = jnp.maximum(ni_ref[...] + nj_ref[...] - 2.0 * cross, 0.0)

    same_graph = gidi_ref[...] == gidj_ref[...]        # int32 compare (exact)
    mask = jnp.logical_and(
        jnp.logical_and(dist2 <= cutoff2, dist2 > mind2), same_graph)
    maskf = mask.astype(jnp.float32)                   # [ti, tj]
    dist = jnp.sqrt(dist2)                             # only needed for RBF

    # ---- RBF expansion + edge-embedding MLP (bf16 MXU, f32 accumulate) ------
    r = mus_ref.shape[1]
    hdim = wrbf_ref.shape[1]
    kdim = ws1e_ref.shape[1]

    diff = dist[:, :, None] - mus_ref[...][None, :, :]             # [ti, tj, r]
    rbf = jnp.exp(-gamma * diff * diff)

    h = jnp.dot(rbf.reshape(ti * tj, r).astype(jnp.bfloat16), wrbf_ref[...],
                preferred_element_type=jnp.float32).reshape(ti, tj, hdim)
    # node-level projections were hoisted out of the pair loop -> add only
    h = (h + ai_ref[...][:, None, :] + bj_ref[...][None, :, :]
           + bbb_ref[...][None, :, :])
    h = jnp.maximum(h, 0.0)                                        # [ti, tj, H]

    pre = jnp.dot(h.reshape(ti * tj, hdim).astype(jnp.bfloat16), ws1e_ref[...],
                  preferred_element_type=jnp.float32).reshape(ti, tj, kdim)
    act = jnp.maximum(pre + ci_ref[...][:, None, :]
                      + bs1_ref[...][None, :, :], 0.0)             # [ti, tj, K]

    # ---- masked segment-sum to the receiver node ----------------------------
    # sum_j m*(act@W2 + b2) == (sum_j m*act) @ W2 + (sum_j m) * b2
    acc_act = jnp.sum(act * maskf[:, :, None], axis=1)             # [ti, K]
    cnt = jnp.sum(maskf, axis=1, keepdims=True)                    # [ti, 1]
    contrib = (jnp.dot(acc_act, ws2_ref[...],
                       preferred_element_type=jnp.float32)
               + cnt * bs2_ref[...])                               # [ti, 3]

    @pl.when(j_step == 0)
    def _():
        scores_ref[...] = jnp.zeros_like(scores_ref)

    scores_ref[...] += contrib


def coordgen_forward(params, latents, atom_types, gt_cart_coords, batch,
                     noise, time_steps, sigmas, cutoff, *,
                     tile_i=None, tile_j=None):
    """Returns (score_loss, dist_reg_loss, pbc_sym_reg_loss) like CoordGen.forward."""
    N = gt_cart_coords.shape[0]
    G = latents.shape[0]
    H = params['W_dst'].shape[1]
    K = params['W_s1_e'].shape[1]
    R = params['W_rbf'].shape[0]

    # --- per-node glue: perturbation + hoisted node-level projections (O(N)) --
    sigmas_per_node = sigmas[time_steps][batch][:, None]
    cart_coords_perturbed = gt_cart_coords + sigmas_per_node * noise   # [N, 3]

    aemb = params['atom_table'][atom_types]                            # [N, E]
    a_dst = aemb @ params['W_dst']                                     # [N, H]
    b_src = aemb @ params['W_src']                                     # [N, H]
    c_lat = latents[batch] @ params['W_s1_l']                          # [N, K]
    gid = batch.astype(jnp.int32)[:, None]                             # [N, 1]

    # --- tiling / padding -----------------------------------------------------
    # j (lane) tiles must be 128-aligned or cover the whole padded node range;
    # i (sublane) tiles must be multiples of 8.
    if tile_j is None:
        tile_j = 128 if N >= 128 else _round_up(N, 8)
    if tile_j % 128 == 0:
        n_pad = _round_up(N, tile_j)
    else:
        n_pad = _round_up(N, 8)
        tile_j = n_pad                      # full-j block for small problems
    if tile_i is None:
        tile_i = next(t for t in (64, 32, 16, 8) if n_pad % t == 0)
    assert n_pad % tile_i == 0 and tile_i % 8 == 0
    assert n_pad % tile_j == 0 and (tile_j % 128 == 0 or tile_j == n_pad)

    pad = n_pad - N

    def padn(x, val):
        return jnp.pad(x, ((0, pad), (0, 0)), constant_values=val)

    cp_p = padn(cart_coords_perturbed, 0.0)                 # [Np, 3]
    gid_p = padn(gid, -1)        # padded nodes belong to no graph -> masked
    a_p = padn(a_dst, 0.0)                                   # [Np, H]
    b_p = padn(b_src, 0.0)                                   # [Np, H]
    c_p = padn(c_lat, 0.0)                                   # [Np, K]

    # lane-major (row-form) views of the j-side node data -> no in-kernel
    # transposes, fully lane-dense [ti, tj] geometry stage.
    cpT_p = cp_p.T                                           # [3, Np]
    gid_row = gid_p.T                                        # [1, Np]
    ni_col = jnp.sum(cp_p * cp_p, axis=1, keepdims=True)     # [Np, 1]
    nj_row = ni_col.T                                        # [1, Np]

    w_rbf = params['W_rbf'].astype(jnp.bfloat16)
    w_s1e = params['W_s1_e'].astype(jnp.bfloat16)

    grid = (n_pad // tile_i, n_pad // tile_j)
    kernel = functools.partial(_coordgen_pair_kernel,
                               float(cutoff) ** 2, float(MIN_DIST) ** 2,
                               RBF_GAMMA, tile_i, tile_j)

    scores_p = pl.pallas_call(
        kernel,
        out_shape=jax.ShapeDtypeStruct((n_pad, 3), jnp.float32),
        grid=grid,
        in_specs=[
            pl.BlockSpec((tile_i, 3), lambda i, j: (i, 0)),   # coords, i tile
            pl.BlockSpec((tile_i, 1), lambda i, j: (i, 0)),   # graph id, i tile
            pl.BlockSpec((tile_i, 1), lambda i, j: (i, 0)),   # |x_i|^2
            pl.BlockSpec((tile_i, H), lambda i, j: (i, 0)),   # aemb@W_dst, i tile
            pl.BlockSpec((tile_i, K), lambda i, j: (i, 0)),   # latent@W_s1_l, i tile
            pl.BlockSpec((3, tile_j), lambda i, j: (0, j)),   # coords^T, j tile
            pl.BlockSpec((1, tile_j), lambda i, j: (0, j)),   # graph id row, j tile
            pl.BlockSpec((1, tile_j), lambda i, j: (0, j)),   # |x_j|^2 row
            pl.BlockSpec((tile_j, H), lambda i, j: (j, 0)),   # aemb@W_src, j tile
            pl.BlockSpec((1, R), lambda i, j: (0, 0)),        # RBF centers
            pl.BlockSpec((R, H), lambda i, j: (0, 0)),        # W_rbf (bf16)
            pl.BlockSpec((1, H), lambda i, j: (0, 0)),        # b_bb
            pl.BlockSpec((H, K), lambda i, j: (0, 0)),        # W_s1_e (bf16)
            pl.BlockSpec((1, K), lambda i, j: (0, 0)),        # b_s1
            pl.BlockSpec((K, 3), lambda i, j: (0, 0)),        # W_s2
            pl.BlockSpec((1, 3), lambda i, j: (0, 0)),        # b_s2
        ],
        out_specs=pl.BlockSpec((tile_i, 3), lambda i, j: (i, 0)),
        compiler_params=pltpu.CompilerParams(
            dimension_semantics=("parallel", "arbitrary")),
    )(cp_p, gid_p, ni_col, a_p, c_p,
      cpT_p, gid_row, nj_row, b_p,
      params['mus'], w_rbf, params['b_bb'], w_s1e, params['b_s1'],
      params['W_s2'], params['b_s2'])

    scores = scores_p[:N]

    # --- tiny per-graph scatter-mean loss epilogue (O(G*N)) in plain JAX ------
    # mse(scores, -noise) -> scatter-mean per graph -> mean
    sq = (scores + noise) ** 2
    onehot_t = (batch[None, :] == jnp.arange(G)[:, None]).astype(jnp.float32)
    counts = jnp.sum(onehot_t, axis=1, keepdims=True)
    gmean = (onehot_t @ sq) / counts
    score_loss = jnp.mean(gmean)
    return score_loss, jnp.float32(0.0), jnp.float32(0.0)


def _reference_forward(params, latents, atom_types, gt_cart_coords, batch,
                       noise, time_steps, sigmas, cutoff):
    """Pure-JAX f32 reference mirroring the kernel math (for a sanity check)."""
    G = latents.shape[0]
    sig_node = sigmas[time_steps][batch][:, None]
    cp = gt_cart_coords + sig_node * noise
    dvec = cp[:, None, :] - cp[None, :, :]
    dist = jnp.sqrt(jnp.sum(dvec ** 2, axis=-1))
    same = batch[:, None] == batch[None, :]
    mask = (dist <= cutoff) & (dist > MIN_DIST) & same

    aemb = params['atom_table'][atom_types]
    rbf = jnp.exp(-RBF_GAMMA * (dist[..., None] - params['mus'][0]) ** 2)
    h = jax.nn.relu(
        (aemb @ params['W_dst'])[:, None, :]
        + (aemb @ params['W_src'])[None, :, :]
        + jnp.einsum('ijr,rh->ijh', rbf, params['W_rbf'])
        + params['b_bb'])
    lat_node = latents[batch]
    pre = (jnp.einsum('ijh,hk->ijk', h, params['W_s1_e'])
           + (lat_node @ params['W_s1_l'])[:, None, :] + params['b_s1'])
    msg = jnp.einsum('ijk,kc->ijc', jax.nn.relu(pre), params['W_s2']) + params['b_s2']
    msg = msg * mask[..., None].astype(jnp.float32)
    scores = jnp.sum(msg, axis=1)

    sq = (scores + noise) ** 2
    onehot_t = (batch[None, :] == jnp.arange(G)[:, None]).astype(jnp.float32)
    counts = jnp.sum(onehot_t, axis=1, keepdims=True)
    gmean = (onehot_t @ sq) / counts
    return jnp.mean(gmean)


if __name__ == "__main__":
    key = jax.random.PRNGKey(0)
    keys = jax.random.split(key, 12)

    # small shapes consistent with the module's forward
    num_graphs, nodes_per_graph = 2, 8
    N = num_graphs * nodes_per_graph
    latent_dim = 16
    hidden_channels = 32      # backbone_params['hidden_channels']
    fc_hidden_dim = 32
    emb_dim = 16
    rbf_dim = 16
    num_atom_types = 5
    num_time_steps, noise_start, noise_end = 10, 0.01, 1.0
    cutoff = 5.0

    batch = jnp.repeat(jnp.arange(num_graphs), nodes_per_graph)
    atom_types = jax.random.randint(keys[0], (N,), 0, num_atom_types)
    gt_cart_coords = 2.0 * jax.random.normal(keys[1], (N, 3), jnp.float32)
    latents = jax.random.normal(keys[2], (num_graphs, latent_dim), jnp.float32)
    noise = jax.random.normal(keys[3], (N, 3), jnp.float32)
    time_steps = jax.random.randint(keys[4], (num_graphs,), 0, num_time_steps)
    sigmas = jnp.exp(jnp.linspace(jnp.log(noise_start), jnp.log(noise_end),
                                  num_time_steps)).astype(jnp.float32)

    def init(k, shape, fan_in):
        return (jax.random.normal(k, shape, jnp.float32) / jnp.sqrt(float(fan_in)))

    params = {
        'atom_table': jax.random.normal(keys[5], (num_atom_types, emb_dim), jnp.float32),
        'W_dst': init(keys[6], (emb_dim, hidden_channels), emb_dim),
        'W_src': init(keys[7], (emb_dim, hidden_channels), emb_dim),
        'W_rbf': init(keys[8], (rbf_dim, hidden_channels), rbf_dim),
        'b_bb': jnp.zeros((1, hidden_channels), jnp.float32),
        'W_s1_e': init(keys[9], (hidden_channels, fc_hidden_dim), hidden_channels),
        'W_s1_l': init(keys[10], (latent_dim, fc_hidden_dim), latent_dim),
        'b_s1': jnp.zeros((1, fc_hidden_dim), jnp.float32),
        'W_s2': init(keys[11], (fc_hidden_dim, 3), fc_hidden_dim),
        'b_s2': jnp.zeros((1, 3), jnp.float32),
        'mus': jnp.linspace(0.0, cutoff, rbf_dim, dtype=jnp.float32)[None, :],
    }

    # small i-tiles so the demo exercises the parallel i grid axis (grid=(2,1));
    # production defaults pick larger tiles and 128-wide j tiles.
    out = coordgen_forward(params, latents, atom_types, gt_cart_coords, batch,
                           noise, time_steps, sigmas, cutoff, tile_i=8)
    score_loss, dist_reg_loss, pbc_loss = jax.block_until_ready(out)

    ref_loss = _reference_forward(params, latents, atom_types, gt_cart_coords,
                                  batch, noise, time_steps, sigmas, cutoff)
    assert bool(jnp.isfinite(score_loss))
    # kernel uses bf16 for the two pair-stage matmuls (f32 accumulate), so
    # compare against the pure-f32 reference with a slightly loose tolerance.
    assert bool(jnp.allclose(score_loss, ref_loss, rtol=2e-2, atol=2e-2)), (
        score_loss, ref_loss)
    print("KERNEL_OK")
</pallas_src>

<mosaic_0001>
module attributes {stable_mosaic.version = 11 : i64} {
  func.func @_coordgen_pair_kernel(%arg0: i32, %arg1: i32, %arg2: memref<8x3xf32, #tpu.memory_space<vmem>>, %arg3: memref<8x1xi32, #tpu.memory_space<vmem>>, %arg4: memref<8x1xf32, #tpu.memory_space<vmem>>, %arg5: memref<8x32xf32, #tpu.memory_space<vmem>>, %arg6: memref<8x32xf32, #tpu.memory_space<vmem>>, %arg7: memref<3x16xf32, #tpu.memory_space<vmem>>, %arg8: memref<1x16xi32, #tpu.memory_space<vmem>>, %arg9: memref<1x16xf32, #tpu.memory_space<vmem>>, %arg10: memref<16x32xf32, #tpu.memory_space<vmem>>, %arg11: memref<1x16xf32, #tpu.memory_space<vmem>>, %arg12: memref<16x32xbf16, #tpu.memory_space<vmem>>, %arg13: memref<1x32xf32, #tpu.memory_space<vmem>>, %arg14: memref<32x32xbf16, #tpu.memory_space<vmem>>, %arg15: memref<1x32xf32, #tpu.memory_space<vmem>>, %arg16: memref<32x3xf32, #tpu.memory_space<vmem>>, %arg17: memref<1x3xf32, #tpu.memory_space<vmem>>, %arg18: memref<8x3xf32, #tpu.memory_space<vmem>>) attributes {dimension_semantics = [#tpu.dimension_semantics<parallel>, #tpu.dimension_semantics<arbitrary>], iteration_bounds = array<i64: 2, 1>, scalar_prefetch = 0 : i64, scratch_operands = 0 : i64, tpu.core_type = #tpu.core_type<tc>, window_params = [{transform_indices = @transform_0, window_bounds = array<i64: 8, 3>}, {transform_indices = @transform_1, window_bounds = array<i64: 8, 1>}, {transform_indices = @transform_2, window_bounds = array<i64: 8, 1>}, {transform_indices = @transform_3, window_bounds = array<i64: 8, 32>}, {transform_indices = @transform_4, window_bounds = array<i64: 8, 32>}, {transform_indices = @transform_5, window_bounds = array<i64: 3, 16>}, {transform_indices = @transform_6, window_bounds = array<i64: 1, 16>}, {transform_indices = @transform_7, window_bounds = array<i64: 1, 16>}, {transform_indices = @transform_8, window_bounds = array<i64: 16, 32>}, {pipeline_mode = #tpu.pipeline_mode<synchronous>, transform_indices = @transform_9, window_bounds = array<i64: 1, 16>}, {pipeline_mode = #tpu.pipeline_mode<synchronous>, transform_indices = @transform_10, window_bounds = array<i64: 16, 32>}, {pipeline_mode = #tpu.pipeline_mode<synchronous>, transform_indices = @transform_11, window_bounds = array<i64: 1, 32>}, {pipeline_mode = #tpu.pipeline_mode<synchronous>, transform_indices = @transform_12, window_bounds = array<i64: 32, 32>}, {pipeline_mode = #tpu.pipeline_mode<synchronous>, transform_indices = @transform_13, window_bounds = array<i64: 1, 32>}, {pipeline_mode = #tpu.pipeline_mode<synchronous>, transform_indices = @transform_14, window_bounds = array<i64: 32, 3>}, {pipeline_mode = #tpu.pipeline_mode<synchronous>, transform_indices = @transform_15, window_bounds = array<i64: 1, 3>}, {transform_indices = @transform_16, window_bounds = array<i64: 8, 3>}]} {
    %c0 = arith.constant 0 : index
    %c0_0 = arith.constant 0 : index
    %0 = vector.load %arg2[%c0, %c0_0] : memref<8x3xf32, #tpu.memory_space<vmem>>, vector<8x3xf32>
    %c0_1 = arith.constant 0 : index
    %c0_2 = arith.constant 0 : index
    %1 = vector.load %arg7[%c0_1, %c0_2] : memref<3x16xf32, #tpu.memory_space<vmem>>, vector<3x16xf32>
    %2 = vector.extract_strided_slice %0 {offsets = [0, 0], sizes = [8, 1], strides = [1, 1]} : vector<8x3xf32> to vector<8x1xf32>
    %3 = vector.extract_strided_slice %1 {offsets = [0, 0], sizes = [1, 16], strides = [1, 1]} : vector<3x16xf32> to vector<1x16xf32>
    %4 = vector.broadcast %2 : vector<8x1xf32> to vector<8x16xf32>
    %5 = vector.broadcast %3 : vector<1x16xf32> to vector<8x16xf32>
    %6 = arith.mulf %4, %5 : vector<8x16xf32>
    %7 = vector.extract_strided_slice %0 {offsets = [0, 1], sizes = [8, 1], strides = [1, 1]} : vector<8x3xf32> to vector<8x1xf32>
    %8 = vector.extract_strided_slice %1 {offsets = [1, 0], sizes = [1, 16], strides = [1, 1]} : vector<3x16xf32> to vector<1x16xf32>
    %9 = vector.broadcast %7 : vector<8x1xf32> to vector<8x16xf32>
    %10 = vector.broadcast %8 : vector<1x16xf32> to vector<8x16xf32>
    %11 = arith.mulf %9, %10 : vector<8x16xf32>
    %12 = arith.addf %6, %11 : vector<8x16xf32>
    %13 = vector.extract_strided_slice %0 {offsets = [0, 2], sizes = [8, 1], strides = [1, 1]} : vector<8x3xf32> to vector<8x1xf32>
    %14 = vector.extract_strided_slice %1 {offsets = [2, 0], sizes = [1, 16], strides = [1, 1]} : vector<3x16xf32> to vector<1x16xf32>
    %15 = vector.broadcast %13 : vector<8x1xf32> to vector<8x16xf32>
    %16 = vector.broadcast %14 : vector<1x16xf32> to vector<8x16xf32>
    %17 = arith.mulf %15, %16 : vector<8x16xf32>
    %18 = arith.addf %12, %17 : vector<8x16xf32>
    %c0_3 = arith.constant 0 : index
    %c0_4 = arith.constant 0 : index
    %19 = vector.load %arg4[%c0_3, %c0_4] : memref<8x1xf32, #tpu.memory_space<vmem>>, vector<8x1xf32>
    %c0_5 = arith.constant 0 : index
    %c0_6 = arith.constant 0 : index
    %20 = vector.load %arg9[%c0_5, %c0_6] : memref<1x16xf32, #tpu.memory_space<vmem>>, vector<1x16xf32>
    %21 = vector.broadcast %19 : vector<8x1xf32> to vector<8x16xf32>
    %22 = vector.broadcast %20 : vector<1x16xf32> to vector<8x16xf32>
    %23 = arith.addf %21, %22 : vector<8x16xf32>
    %cst = arith.constant 2.000000e+00 : f32
    %24 = vector.broadcast %cst : f32 to vector<8x16xf32>
    %25 = arith.mulf %24, %18 : vector<8x16xf32>
    %26 = arith.subf %23, %25 : vector<8x16xf32>
    %cst_7 = arith.constant 0.000000e+00 : f32
    %27 = vector.broadcast %cst_7 : f32 to vector<8x16xf32>
    %28 = arith.maximumf %26, %27 : vector<8x16xf32>
    %c0_8 = arith.constant 0 : index
    %c0_9 = arith.constant 0 : index
    %29 = vector.load %arg3[%c0_8, %c0_9] : memref<8x1xi32, #tpu.memory_space<vmem>>, vector<8x1xi32>
    %c0_10 = arith.constant 0 : index
    %c0_11 = arith.constant 0 : index
    %30 = vector.load %arg8[%c0_10, %c0_11] : memref<1x16xi32, #tpu.memory_space<vmem>>, vector<1x16xi32>
    %31 = vector.broadcast %29 : vector<8x1xi32> to vector<8x16xi32>
    %32 = vector.broadcast %30 : vector<1x16xi32> to vector<8x16xi32>
    %33 = arith.cmpi eq, %31, %32 : vector<8x16xi32>
    %cst_12 = arith.constant 2.500000e+01 : f32
    %34 = vector.broadcast %cst_12 : f32 to vector<8x16xf32>
    %35 = arith.cmpf ole, %28, %34 : vector<8x16xf32>
    %cst_13 = arith.constant 9.99999996E-13 : f32
    %36 = vector.broadcast %cst_13 : f32 to vector<8x16xf32>
    %37 = arith.cmpf ogt, %28, %36 : vector<8x16xf32>
    %38 = arith.andi %35, %37 : vector<8x16xi1>
    %39 = arith.andi %38, %33 : vector<8x16xi1>
    %40 = arith.extui %39 : vector<8x16xi1> to vector<8x16xi32>
    %41 = arith.sitofp %40 : vector<8x16xi32> to vector<8x16xf32>
    %42 = math.sqrt %28 : vector<8x16xf32>
    %43 = vector.shape_cast %42 : vector<8x16xf32> to vector<8x16x1xf32>
    %c0_14 = arith.constant 0 : index
    %c0_15 = arith.constant 0 : index
    %44 = vector.load %arg11[%c0_14, %c0_15] : memref<1x16xf32, #tpu.memory_space<vmem>>, vector<1x16xf32>
    %45 = vector.shape_cast %44 : vector<1x16xf32> to vector<1x1x16xf32>
    %46 = vector.broadcast %43 : vector<8x16x1xf32> to vector<8x16x16xf32>
    %47 = vector.broadcast %45 : vector<1x1x16xf32> to vector<8x16x16xf32>
    %48 = arith.subf %46, %47 : vector<8x16x16xf32>
    %cst_16 = arith.constant -1.000000e+01 : f32
    %49 = vector.broadcast %cst_16 : f32 to vector<8x16x16xf32>
    %50 = arith.mulf %49, %48 : vector<8x16x16xf32>
    %51 = arith.mulf %50, %48 : vector<8x16x16xf32>
    %52 = math.exp %51 : vector<8x16x16xf32>
    %53 = vector.shape_cast %52 : vector<8x16x16xf32> to vector<128x16xf32>
    %54 = arith.truncf %53 : vector<128x16xf32> to vector<128x16xbf16>
    %c0_17 = arith.constant 0 : index
    %c0_18 = arith.constant 0 : index
    %55 = vector.load %arg12[%c0_17, %c0_18] : memref<16x32xbf16, #tpu.memory_space<vmem>>, vector<16x32xbf16>
    %cst_19 = arith.constant dense<0.000000e+00> : vector<128x32xf32>
    %56 = tpu.matmul %54, %55, %cst_19 {dimension_numbers = #tpu.dot_dimension_numbers<[1], [0], [0], [1], [0, 0, 1, 1], [], []>} : vector<128x16xbf16>, vector<16x32xbf16>, vector<128x32xf32> -> vector<128x32xf32>
    %57 = vector.shape_cast %56 : vector<128x32xf32> to vector<8x16x32xf32>
    %c0_20 = arith.constant 0 : index
    %c0_21 = arith.constant 0 : index
    %58 = vector.load %arg5[%c0_20, %c0_21] : memref<8x32xf32, #tpu.memory_space<vmem>>, vector<8x32xf32>
    %59 = vector.shape_cast %58 : vector<8x32xf32> to vector<8x1x32xf32>
    %60 = vector.broadcast %59 : vector<8x1x32xf32> to vector<8x16x32xf32>
    %61 = arith.addf %57, %60 : vector<8x16x32xf32>
    %c0_22 = arith.constant 0 : index
    %c0_23 = arith.constant 0 : index
    %62 = vector.load %arg10[%c0_22, %c0_23] : memref<16x32xf32, #tpu.memory_space<vmem>>, vector<16x32xf32>
    %63 = vector.shape_cast %62 : vector<16x32xf32> to vector<1x16x32xf32>
    %64 = vector.broadcast %63 : vector<1x16x32xf32> to vector<8x16x32xf32>
    %65 = arith.addf %61, %64 : vector<8x16x32xf32>
    %c0_24 = arith.constant 0 : index
    %c0_25 = arith.constant 0 : index
    %66 = vector.load %arg13[%c0_24, %c0_25] : memref<1x32xf32, #tpu.memory_space<vmem>>, vector<1x32xf32>
    %67 = vector.shape_cast %66 : vector<1x32xf32> to vector<1x1x32xf32>
    %68 = vector.broadcast %67 : vector<1x1x32xf32> to vector<8x16x32xf32>
    %69 = arith.addf %65, %68 : vector<8x16x32xf32>
    %cst_26 = arith.constant 0.000000e+00 : f32
    %70 = vector.broadcast %cst_26 : f32 to vector<8x16x32xf32>
    %71 = arith.maximumf %69, %70 : vector<8x16x32xf32>
    %72 = vector.shape_cast %71 : vector<8x16x32xf32> to vector<128x32xf32>
    %73 = arith.truncf %72 : vector<128x32xf32> to vector<128x32xbf16>
    %c0_27 = arith.constant 0 : index
    %c0_28 = arith.constant 0 : index
    %74 = vector.load %arg14[%c0_27, %c0_28] : memref<32x32xbf16, #tpu.memory_space<vmem>>, vector<32x32xbf16>
    %cst_29 = arith.constant dense<0.000000e+00> : vector<128x32xf32>
    %75 = tpu.matmul %73, %74, %cst_29 {dimension_numbers = #tpu.dot_dimension_numbers<[1], [0], [0], [1], [0, 0, 1, 1], [], []>} : vector<128x32xbf16>, vector<32x32xbf16>, vector<128x32xf32> -> vector<128x32xf32>
    %76 = vector.shape_cast %75 : vector<128x32xf32> to vector<8x16x32xf32>
    %c0_30 = arith.constant 0 : index
    %c0_31 = arith.constant 0 : index
    %77 = vector.load %arg6[%c0_30, %c0_31] : memref<8x32xf32, #tpu.memory_space<vmem>>, vector<8x32xf32>
    %78 = vector.shape_cast %77 : vector<8x32xf32> to vector<8x1x32xf32>
    %79 = vector.broadcast %78 : vector<8x1x32xf32> to vector<8x16x32xf32>
    %80 = arith.addf %76, %79 : vector<8x16x32xf32>
    %c0_32 = arith.constant 0 : index
    %c0_33 = arith.constant 0 : index
    %81 = vector.load %arg15[%c0_32, %c0_33] : memref<1x32xf32, #tpu.memory_space<vmem>>, vector<1x32xf32>
    %82 = vector.shape_cast %81 : vector<1x32xf32> to vector<1x1x32xf32>
    %83 = vector.broadcast %82 : vector<1x1x32xf32> to vector<8x16x32xf32>
    %84 = arith.addf %80, %83 : vector<8x16x32xf32>
    %cst_34 = arith.constant 0.000000e+00 : f32
    %85 = vector.broadcast %cst_34 : f32 to vector<8x16x32xf32>
    %86 = arith.maximumf %84, %85 : vector<8x16x32xf32>
    %87 = vector.shape_cast %41 : vector<8x16xf32> to vector<8x16x1xf32>
    %88 = vector.broadcast %87 : vector<8x16x1xf32> to vector<8x16x32xf32>
    %89 = arith.mulf %86, %88 : vector<8x16x32xf32>
    %cst_35 = arith.constant dense<0.000000e+00> : vector<8x32xf32>
    %90 = vector.multi_reduction <add>, %89, %cst_35 [1] : vector<8x16x32xf32> to vector<8x32xf32>
    %cst_36 = arith.constant dense<0.000000e+00> : vector<8xf32>
    %91 = vector.multi_reduction <add>, %41, %cst_36 [1] : vector<8x16xf32> to vector<8xf32>
    %92 = vector.shape_cast %91 : vector<8xf32> to vector<8x1xf32>
    %c0_37 = arith.constant 0 : index
    %c0_38 = arith.constant 0 : index
    %93 = vector.load %arg16[%c0_37, %c0_38] : memref<32x3xf32, #tpu.memory_space<vmem>>, vector<32x3xf32>
    %cst_39 = arith.constant dense<0.000000e+00> : vector<8x3xf32>
    %94 = tpu.matmul %90, %93, %cst_39 {dimension_numbers = #tpu.dot_dimension_numbers<[1], [0], [0], [1], [0, 0, 1, 1], [], []>} : vector<8x32xf32>, vector<32x3xf32>, vector<8x3xf32> -> vector<8x3xf32>
    %c0_40 = arith.constant 0 : index
    %c0_41 = arith.constant 0 : index
    %95 = vector.load %arg17[%c0_40, %c0_41] : memref<1x3xf32, #tpu.memory_space<vmem>>, vector<1x3xf32>
    %96 = vector.broadcast %92 : vector<8x1xf32> to vector<8x3xf32>
    %97 = vector.broadcast %95 : vector<1x3xf32> to vector<8x3xf32>
    %98 = arith.mulf %96, %97 : vector<8x3xf32>
    %99 = arith.addf %94, %98 : vector<8x3xf32>
    %c0_i32 = arith.constant 0 : i32
    %100 = arith.cmpi eq, %arg1, %c0_i32 : i32
    %101 = arith.extui %100 : i1 to i32
    %c0_i32_42 = arith.constant 0 : i32
    %102 = arith.cmpi ne, %101, %c0_i32_42 : i32
    scf.if %102 {
      %cst_47 = arith.constant 0.000000e+00 : f32
      %106 = vector.broadcast %cst_47 : f32 to vector<8x3xf32>
      %c0_48 = arith.constant 0 : index
      %c0_49 = arith.constant 0 : index
      %107 = vector.load %arg18[%c0_48, %c0_49] : memref<8x3xf32, #tpu.memory_space<vmem>>, vector<8x3xf32>
      tpu.vector_store %arg18[%c0_48, %c0_49], %106 {strides = array<i32>} : memref<8x3xf32, #tpu.memory_space<vmem>>, vector<8x3xf32>,
    } else {
    }
    %c0_43 = arith.constant 0 : index
    %c0_44 = arith.constant 0 : index
    %103 = vector.load %arg18[%c0_43, %c0_44] : memref<8x3xf32, #tpu.memory_space<vmem>>, vector<8x3xf32>
    %104 = arith.addf %103, %99 : vector<8x3xf32>
    %c0_45 = arith.constant 0 : index
    %c0_46 = arith.constant 0 : index
    %105 = vector.load %arg18[%c0_45, %c0_46] : memref<8x3xf32, #tpu.memory_space<vmem>>, vector<8x3xf32>
    tpu.vector_store %arg18[%c0_45, %c0_46], %104 {strides = array<i32>} : memref<8x3xf32, #tpu.memory_space<vmem>>, vector<8x3xf32>,
    return
  }
  func.func @transform_0(%arg0: i32, %arg1: i32) -> (i32, i32) {
    %c0_i32 = arith.constant 0 : i32
    %c0_i32_0 = arith.constant 0 : i32
    return %arg0, %c0_i32 : i32, i32
  }
  func.func @transform_1(%arg0: i32, %arg1: i32) -> (i32, i32) {
    %c0_i32 = arith.constant 0 : i32
    %c0_i32_0 = arith.constant 0 : i32
    return %arg0, %c0_i32 : i32, i32
  }
  func.func @transform_2(%arg0: i32, %arg1: i32) -> (i32, i32) {
    %c0_i32 = arith.constant 0 : i32
    %c0_i32_0 = arith.constant 0 : i32
    return %arg0, %c0_i32 : i32, i32
  }
  func.func @transform_3(%arg0: i32, %arg1: i32) -> (i32, i32) {
    %c0_i32 = arith.constant 0 : i32
    %c0_i32_0 = arith.constant 0 : i32
    return %arg0, %c0_i32 : i32, i32
  }
  func.func @transform_4(%arg0: i32, %arg1: i32) -> (i32, i32) {
    %c0_i32 = arith.constant 0 : i32
    %c0_i32_0 = arith.constant 0 : i32
    return %arg0, %c0_i32 : i32, i32
  }
  func.func @transform_5(%arg0: i32, %arg1: i32) -> (i32, i32) {
    %c0_i32 = arith.constant 0 : i32
    %c0_i32_0 = arith.constant 0 : i32
    return %c0_i32, %arg1 : i32, i32
  }
  func.func @transform_6(%arg0: i32, %arg1: i32) -> (i32, i32) {
    %c0_i32 = arith.constant 0 : i32
    %c0_i32_0 = arith.constant 0 : i32
    return %c0_i32, %arg1 : i32, i32
  }
  func.func @transform_7(%arg0: i32, %arg1: i32) -> (i32, i32) {
    %c0_i32 = arith.constant 0 : i32
    %c0_i32_0 = arith.constant 0 : i32
    return %c0_i32, %arg1 : i32, i32
  }
  func.func @transform_8(%arg0: i32, %arg1: i32) -> (i32, i32) {
    %c0_i32 = arith.constant 0 : i32
    %c0_i32_0 = arith.constant 0 : i32
    return %arg1, %c0_i32 : i32, i32
  }
  func.func @transform_9(%arg0: i32, %arg1: i32) -> (i32, i32) {
    %c0_i32 = arith.constant 0 : i32
    %c0_i32_0 = arith.constant 0 : i32
    %c0_i32_1 = arith.constant 0 : i32
    return %c0_i32, %c0_i32_0 : i32, i32
  }
  func.func @transform_10(%arg0: i32, %arg1: i32) -> (i32, i32) {
    %c0_i32 = arith.constant 0 : i32
    %c0_i32_0 = arith.constant 0 : i32
    %c0_i32_1 = arith.constant 0 : i32
    return %c0_i32, %c0_i32_0 : i32, i32
  }
  func.func @transform_11(%arg0: i32, %arg1: i32) -> (i32, i32) {
    %c0_i32 = arith.constant 0 : i32
    %c0_i32_0 = arith.constant 0 : i32
    %c0_i32_1 = arith.constant 0 : i32
    return %c0_i32, %c0_i32_0 : i32, i32
  }
  func.func @transform_12(%arg0: i32, %arg1: i32) -> (i32, i32) {
    %c0_i32 = arith.constant 0 : i32
    %c0_i32_0 = arith.constant 0 : i32
    %c0_i32_1 = arith.constant 0 : i32
    return %c0_i32, %c0_i32_0 : i32, i32
  }
  func.func @transform_13(%arg0: i32, %arg1: i32) -> (i32, i32) {
    %c0_i32 = arith.constant 0 : i32
    %c0_i32_0 = arith.constant 0 : i32
    %c0_i32_1 = arith.constant 0 : i32
    return %c0_i32, %c0_i32_0 : i32, i32
  }
  func.func @transform_14(%arg0: i32, %arg1: i32) -> (i32, i32) {
    %c0_i32 = arith.constant 0 : i32
    %c0_i32_0 = arith.constant 0 : i32
    %c0_i32_1 = arith.constant 0 : i32
    return %c0_i32, %c0_i32_0 : i32, i32
  }
  func.func @transform_15(%arg0: i32, %arg1: i32) -> (i32, i32) {
    %c0_i32 = arith.constant 0 : i32
    %c0_i32_0 = arith.constant 0 : i32
    %c0_i32_1 = arith.constant 0 : i32
    return %c0_i32, %c0_i32_0 : i32, i32
  }
  func.func @transform_16(%arg0: i32, %arg1: i32) -> (i32, i32) {
    %c0_i32 = arith.constant 0 : i32
    %c0_i32_0 = arith.constant 0 : i32
    return %arg0, %c0_i32 : i32, i32
  }
}

</mosaic_0001>

<bundles_post_ra>
// kernel: tpu_custom_call.1
= control target key start
LH: loop header
LB: loop body
LE: loop exit
PB: predicated region body
PF: predicated region fallthrough
CT: control target
= control target key end

     0   :  { %s2279_s21 = smov 0   ;;  %s2281_s22 = smov 0   ;;  %s2592_s0 = inlined_call_operand.vmem [shape: f32[16,3], index: 0, kind: input, shape index: {}]   ;;  %s2593_s1 = inlined_call_operand.vmem [shape: s32[16,1], index: 1, kind: input, shape index: {}]   ;;  %s2594_s2 = inlined_call_operand.vmem [shape: f32[16,1], index: 2, kind: input, shape index: {}]   ;;  %s2595_s3 = inlined_call_operand.vmem [shape: f32[16,32], index: 3, kind: input, shape index: {}]   ;;  %s2596_s4 = inlined_call_operand.vmem [shape: f32[16,32], index: 4, kind: input, shape index: {}]   ;;  %s2597_s5 = inlined_call_operand.vmem [shape: f32[3,16], index: 5, kind: input, shape index: {}]   ;;  %s2598_s6 = inlined_call_operand.vmem [shape: s32[1,16], index: 6, kind: input, shape index: {}]   ;;  %s2599_s7 = inlined_call_operand.vmem [shape: f32[1,16], index: 7, kind: input, shape index: {}]   ;;  %s2600_s8 = inlined_call_operand.vmem [shape: f32[16,32], index: 8, kind: input, shape index: {}]   ;;  %s2601_s9 = inlined_call_operand.vmem [shape: f32[1,16], index: 9, kind: input, shape index: {}]   ;;  %s2602_s10 = inlined_call_operand.vmem [shape: bf16[16,32], index: 10, kind: input, shape index: {}]   ;;  %s2603_s11 = inlined_call_operand.vmem [shape: f32[1,32], index: 11, kind: input, shape index: {}]   ;;  %s2604_s12 = inlined_call_operand.vmem [shape: bf16[32,32], index: 12, kind: input, shape index: {}]   ;;  %s2605_s13 = inlined_call_operand.vmem [shape: f32[1,32], index: 13, kind: input, shape index: {}]   ;;  %s2606_s14 = inlined_call_operand.vmem [shape: f32[32,3], index: 14, kind: input, shape index: {}]   ;;  %s2607_s15 = inlined_call_operand.vmem [shape: f32[1,3], index: 15, kind: input, shape index: {}]   ;;  %s2608_s16 = inlined_call_operand.vmem [shape: f32[16,3], index: 16, kind: output, shape index: {}]  }
   0x1   :  { %2609 = sst [smem:[#allocation2_spill]] %s2592_s0  ;;  %s2283_s23 = smov 0  }
   0x2 LB: > { %s38_s24 = sadd.s32 1, %s2181_s22  ;;  %p1973_p0 = scmp.ge.s32.totalorder %s2185_s23, 1  ;;  %s2185_s23 = sphi %s2283_s23, %s26_s23   ;;  %s2181_s22 = sphi %s2281_s22, %s2612_s22   ;;  %s2177_s21 = sphi %s2279_s21, %s2611_s21  }
   0x3   : > { %p40_p1 = scmp.ge.s32.totalorder %s38_s24, 2  ;;  %p545_p2 = scmp.lt.s32.totalorder %s2185_s23, 3 }
   0x5   : > { %s2614_s24 = smov (%p40_p1, %s38_s24), 0  ;;  %p546_p3 = pnand %p1973_p0, %p545_p2 }
   0x6   : > { %p624_p4 = scmp.lt.s32.totalorder (!%p546_p3), %s2177_s21, 1  ;;  %v2187_v0 = vmov (!%p546_p3), 0   ;;  %v2188_v1 = vmov (!%p546_p3), 2   ;;  %s2610_s28 = sld [smem:[#allocation2_spill]] (!%p546_p3)  ;;  %v2189_v4 = vmov (!%p546_p3), 1   ;;  %v672_v5 = vlaneseq (!%p546_p3)  ;;  %v2124_v37 = vld [vmem:[%s2602_s10] sm:$0xff] (!%p546_p3)  }
   0x7   : > { %549 = sbr.rel (%p546_p3) target bundleno = 1030 (0x406), region = 84  ;;  %2119 = vset.pattern.permute.xlu0 (!%p546_p3), %v2187_v0  ;;  %2121 = vset.pattern.permute.xlu1 (!%p546_p3), %v2188_v1  ;;  %v666_v10 = vld [vmem:[%s2597_s5] sm:$0x7] (!%p546_p3)  ;;  %vm928_vm2 = vcmask (!%p546_p3), 130048   ;;  %vm1238_vm8 = vcmask (!%p546_p3), 261120   ;;  %vm2193_vm9 = vmmov (!%p546_p3), 0  }
   0x8   : > { %v2307_v6 = vshrl.u32 (!%p546_p3), %v672_v5, 7  ;;  %v1980_v20 = vld [vmem:[%s2599_s7] ss:$0 sm:$0xff] (!%p546_p3)  ;;  %2033 = vmatprep.subr.bf16.mxu0 (!%p546_p3), %v2124_v37  ;;  %vm1705_vm10 = vcmask (!%p546_p3), 1041409   ;;  %vm1707_vm11 = vcmask (!%p546_p3), 1042434   ;;  %vm1709_vm12 = vcmask (!%p546_p3), 1043459  }
   0x9   : > { %2034 = vmatpush3.bf16.msra.mxu0 (!%p546_p3), %v2124_v37  ;;  %v2363_v48 = vld [vmem:[%s2601_s9] ss:$0 sm:$0xff] (!%p546_p3)  ;;  %vm1711_vm13 = vcmask (!%p546_p3), 1044484   ;;  %vm1713_vm14 = vcmask (!%p546_p3), 1045509   ;;  %vm1715_vm15 = vcmask (!%p546_p3), 1046534  }
   0xa   : > { %v2310_v7 = vsub.s32 (!%p546_p3), 0, %v2307_v6  ;;  %v2313_v8 = vsub.s32 (!%p546_p3), 1, %v2307_v6  ;;  %v2316_v9 = vsub.s32 (!%p546_p3), 2, %v2307_v6  ;;  %v772_v36 = vsub.s32 (!%p546_p3), 3, %v2307_v6 }
   0xb   : > { %v783_v39 = vsub.s32 (!%p546_p3), 4, %v2307_v6  ;;  %v794_v41 = vsub.s32 (!%p546_p3), 5, %v2307_v6  ;;  %v805_v43 = vsub.s32 (!%p546_p3), 6, %v2307_v6  ;;  %v816_v45 = vsub.s32 (!%p546_p3), 7, %v2307_v6 }
   0xc   : > { %v675_v13 = vrot.slane (!%p546_p3), %v666_v10, %v2310_v7  ;;  %v684_v14 = vrot.slane (!%p546_p3), %v666_v10, %v2313_v8  ;;  %v694_v15 = vrot.slane (!%p546_p3), %v666_v10, %v2316_v9 }
   0xe   : > { %s2616_s21 = smov (!%p624_p4, %s2177_s21), 1 }
   0xf   : > { %s2297_s25 = sshll.u32 %s2616_s21, 3 }
  0x10   : > { %s627_s29 = scalar_lea.vmem %s2610_s28, %s2297_s25  ;;  %s635_s17 = scalar_lea.vmem %s2594_s2, %s2297_s25 }
  0x11   : > { %v665_v2 = vld [vmem:[%s627_s29] sm:$0xff]  ;;  %s631_s30 = scalar_lea.vmem %s2593_s1, %s2297_s25  ;;  %s643_s21 = scalar_lea.vmem %s2596_s4, %s2297_s25 }
  0x12   : > { %669 = vperm.xlu0 %2119, %v665_v2   ;;  %688 = vperm.xlu1 %2121, %v665_v2   ;;  %v697_v3 = vld [vmem:[%s635_s17] sm:$0xff] }
  0x13   : > { %v714_v47 = vld [vmem:[%s631_s30] sm:$0xff]  ;;  %s639_s30 = scalar_lea.vmem %s2595_s3, %s2297_s25 }
  0x16   : > { %2120 = vset.pattern.permute.xlu0 %v2189_v4  ;;  %2122 = vset.pattern.permute.xlu1 %v2187_v0 }
  0x17   : > { %678 = vperm.xlu0 %2120, %v665_v2   ;;  %701 = vperm.xlu1 %2122, %v697_v3  }
  0x1b   : > { %2123 = vset.pattern.permute.xlu0 %v2187_v0 }
  0x91   : > { %v670_v11 = vpop.permute.xlu0 %669  ;;  %v689_v12 = vpop.permute.xlu1 %688 }
  0x92   : > { %v676_v17 = vmul.f32 %v675_v13, %v670_v11  ;;  %v695_v19 = vmul.f32 %v694_v15, %v689_v12 }
  0x96   : > { %v679_v16 = vpop.permute.xlu0 %678  ;;  %v702_v21 = vpop.permute.xlu1 %701 }
  0x97   : > { %v685_v18 = vmul.f32 %v684_v14, %v679_v16  ;;  %v710_v24 = vadd.f32 %v1980_v20, %v702_v21 }
  0x99   : > { %v686_v22 = vadd.f32 %v685_v18, %v676_v17 }
  0x9b   : > { %v696_v23 = vadd.f32 %v695_v19, %v686_v22 }
  0x9d   : > { %v711_v25 = vmul.f32 2.0, %v696_v23 }
  0x9f   : > { %v712_v26 = vsub.f32 %v710_v24, %v711_v25 }
  0xa1   : > { %v2327_v27 = vmax.f32 %v712_v26, 0.0 }
  0xa3   : > { %2129 = vrsqrt.f32 %v2327_v27  ;;  %vm732_vm0 = vcmp.eq.f32.partialorder %v2327_v27, inf  ;;  %v735_v30 = vand.u32 2147483648, %v2327_v27  ;;  %vm734_vm1 = vcmp.eq.f32.partialorder %v2327_v27, 0.0 }
  0xa4   : > { %vm724_vm3 = vcmp.le.f32.partialorder %v2327_v27, 25.0  ;;  %vm725_vm4 = vcmp.gt.f32.partialorder %v2327_v27, 1e-12 }
  0xa5   : > { %vm726_vm6 = vmand %vm724_vm3, %vm725_vm4 }
  0xad   : > { %v2130_v28 = vpop.eup %2129 }
  0xae   : > { %v731_v29 = vmul.f32 %v2130_v28, %v2327_v27 }
  0xb0   : > { %v733_v31 = vsel %vm732_vm0, %v2327_v27, %v731_v29  ;;  %vm1717_vm0 = vcmask 1047559  }
  0xb1   : > { %v736_v32 = vsel %vm734_vm1, %v735_v30, %v733_v31  ;;  %vm1795_vm1 = vcmask 23552  }
  0xb2   : > { %v740_v33 = vrot.slane %v736_v32, %v2310_v7  ;;  %v751_v34 = vrot.slane %v736_v32, %v2313_v8  ;;  %v762_v35 = vrot.slane %v736_v32, %v2316_v9  ;;  %v773_v38 = vrot.slane %v736_v32, %v772_v36 }
  0xb3   : > { %v784_v40 = vrot.slane %v736_v32, %v783_v39  ;;  %v795_v42 = vrot.slane %v736_v32, %v794_v41  ;;  %v806_v44 = vrot.slane %v736_v32, %v805_v43  ;;  %v817_v46 = vrot.slane %v736_v32, %v816_v45 }
  0xb4   : > { %746 = vbcast.lane.b32.xlu0 %v740_v33, 264  ;;  %742 = vbcast.lane.b32.xlu1 %v740_v33, 256 }
  0xb8   : > { %757 = vbcast.lane.b32.xlu0 %v751_v34, 264  ;;  %753 = vbcast.lane.b32.xlu1 %v751_v34, 256 }
  0xbc   : > { %768 = vbcast.lane.b32.xlu0 %v762_v35, 264  ;;  %764 = vbcast.lane.b32.xlu1 %v762_v35, 256 }
  0xc0   : > { %779 = vbcast.lane.b32.xlu0 %v773_v38, 264  ;;  %775 = vbcast.lane.b32.xlu1 %v773_v38, 256 }
  0xc4   : > { %790 = vbcast.lane.b32.xlu0 %v784_v40, 264  ;;  %786 = vbcast.lane.b32.xlu1 %v784_v40, 256 }
  0xc8   : > { %801 = vbcast.lane.b32.xlu0 %v795_v42, 264  ;;  %797 = vbcast.lane.b32.xlu1 %v795_v42, 256 }
  0xcc   : > { %812 = vbcast.lane.b32.xlu0 %v806_v44, 264  ;;  %808 = vbcast.lane.b32.xlu1 %v806_v44, 256 }
  0xd0   : > { %823 = vbcast.lane.b32.xlu0 %v817_v46, 264  ;;  %819 = vbcast.lane.b32.xlu1 %v817_v46, 256 }
  0xd4   : > { %717 = vperm.xlu1 %2122, %v714_v47  }
 0x126   : > { %v747_v49 = vpop.permute.xlu0 %746  ;;  %v743_v50 = vpop.permute.xlu1 %742 }
 0x127   : > { %v833_v51 = vsub.f32 %v747_v49, %v2363_v48  ;;  %v832_v52 = vsub.f32 %v743_v50, %v2363_v48 }
 0x129   : > { %v849_v53 = vmul.f32 -10.0, %v833_v51  ;;  %v848_v54 = vmul.f32 -10.0, %v832_v52 }
 0x12a   : > { %v758_v55 = vpop.permute.xlu0 %757  ;;  %v754_v56 = vpop.permute.xlu1 %753 }
 0x12b   : > { %v865_v57 = vmul.f32 %v849_v53, %v833_v51  ;;  %v864_v58 = vmul.f32 %v848_v54, %v832_v52  ;;  %v835_v59 = vsub.f32 %v758_v55, %v2363_v48  ;;  %v834_v60 = vsub.f32 %v754_v56, %v2363_v48 }
 0x12d   : > { %v882_v61 = vmul.f32 1.442695, %v865_v57  ;;  %v880_v62 = vmul.f32 1.442695, %v864_v58  ;;  %v851_v63 = vmul.f32 -10.0, %v835_v59  ;;  %v850_v0 = vmul.f32 -10.0, %v834_v60 }
 0x12e   : > { %v769_v1 = vpop.permute.xlu0 %768  ;;  %v765_v2 = vpop.permute.xlu1 %764 }
 0x12f   : > { %2131 = vpow2.f32 %v882_v61  ;;  %v867_v3 = vmul.f32 %v851_v63, %v835_v59  ;;  %v866_v4 = vmul.f32 %v850_v0, %v834_v60  ;;  %v837_v5 = vsub.f32 %v769_v1, %v2363_v48 }
 0x130   : > { %2133 = vpow2.f32 %v880_v62  ;;  %v836_v10 = vsub.f32 %v765_v2, %v2363_v48 }
 0x131   : > { %v886_v11 = vmul.f32 1.442695, %v867_v3  ;;  %v884_v12 = vmul.f32 1.442695, %v866_v4  ;;  %v853_v13 = vmul.f32 -10.0, %v837_v5 }
 0x132   : > { %v852_v14 = vmul.f32 -10.0, %v836_v10  ;;  %v780_v15 = vpop.permute.xlu0 %779  ;;  %v776_v16 = vpop.permute.xlu1 %775 }
 0x133   : > { %2135 = vpow2.f32 %v886_v11  ;;  %v869_v17 = vmul.f32 %v853_v13, %v837_v5  ;;  %v839_v18 = vsub.f32 %v780_v15, %v2363_v48  ;;  %v838_v19 = vsub.f32 %v776_v16, %v2363_v48 }
 0x134   : > { %2137 = vpow2.f32 %v884_v12  ;;  %v868_v20 = vmul.f32 %v852_v14, %v836_v10 }
 0x135   : > { %v890_v21 = vmul.f32 1.442695, %v869_v17  ;;  %v855_v22 = vmul.f32 -10.0, %v839_v18  ;;  %v854_v23 = vmul.f32 -10.0, %v838_v19 }
 0x136   : > { %v888_v24 = vmul.f32 1.442695, %v868_v20  ;;  %v791_v25 = vpop.permute.xlu0 %790  ;;  %v787_v26 = vpop.permute.xlu1 %786 }
 0x137   : > { %2139 = vpow2.f32 %v890_v21  ;;  %v871_v28 = vmul.f32 %v855_v22, %v839_v18  ;;  %v870_v29 = vmul.f32 %v854_v23, %v838_v19  ;;  %v841_v30 = vsub.f32 %v791_v25, %v2363_v48 }
 0x138   : > { %2141 = vpow2.f32 %v888_v24  ;;  %v840_v31 = vsub.f32 %v787_v26, %v2363_v48 }
 0x139   : > { %v2132_v32 = vpop.eup %2131  ;;  %v894_v33 = vmul.f32 1.442695, %v871_v28  ;;  %v892_v34 = vmul.f32 1.442695, %v870_v29  ;;  %v857_v35 = vmul.f32 -10.0, %v841_v30 }
 0x13a   : > { %v2134_v37 = vpop.eup %2133  ;;  %v856_v38 = vmul.f32 -10.0, %v840_v31  ;;  %v802_v40 = vpop.permute.xlu0 %801 }
 0x13b   : > { %v798_v42 = vpop.permute.xlu1 %797  ;;  %2143 = vpow2.f32 %v894_v33  ;;  %v873_v44 = vmul.f32 %v857_v35, %v841_v30  ;;  %v843_v46 = vsub.f32 %v802_v40, %v2363_v48  ;;  %v912_v50 = vpack.c.bf16 %v2132_v32, %v2134_v37  ;;  %v1981_v35 = vld [vmem:[%s2598_s6] ss:$0 sm:$0xff] }
 0x13c   : > { %v842_v47 = vsub.f32 %v798_v42, %v2363_v48  ;;  %2145 = vpow2.f32 %v892_v34  ;;  %v872_v49 = vmul.f32 %v856_v38, %v840_v31 }
 0x13d   : > { %v2136_v51 = vpop.eup %2135  ;;  %v898_v52 = vmul.f32 1.442695, %v873_v44  ;;  %v859_v53 = vmul.f32 -10.0, %v843_v46  ;;  %2035 = vmatprep.mubr.msk.bf16.mxu0 %vm928_vm2, %v912_v50 }
 0x13e   : > { %v858_v54 = vmul.f32 -10.0, %v842_v47  ;;  %v2138_v55 = vpop.eup %2137  ;;  %v896_v56 = vmul.f32 1.442695, %v872_v49  ;;  %v813_v57 = vpop.permute.xlu0 %812 }
 0x13f   : > { %v809_v58 = vpop.permute.xlu1 %808  ;;  %2147 = vpow2.f32 %v898_v52  ;;  %v875_v59 = vmul.f32 %v859_v53, %v843_v46  ;;  %v845_v61 = vsub.f32 %v813_v57, %v2363_v48  ;;  %v913_v63 = vpack.c.bf16 %v2136_v51, %v2138_v55  ;;  %v1050_v57 = vld [vmem:[%s639_s30] sm:$0xff]  ;;  %s663_s30 = scalar_lea.vmem %s2608_s16, %s2297_s25 }
 0x140   : > { %v874_v60 = vmul.f32 %v858_v54, %v842_v47  ;;  %2149 = vpow2.f32 %v896_v56  ;;  %v844_v62 = vsub.f32 %v809_v58, %v2363_v48  ;;  %v2190_v46 = vmov 0.0  }
 0x141   : > { %v2140_v0 = vpop.eup %2139  ;;  %v902_v1 = vmul.f32 1.442695, %v875_v59  ;;  %v861_v3 = vmul.f32 -10.0, %v845_v61  ;;  %2036 = vmatmul.mubr.msk.bf16.vlgmr.msra.gmra.mrb[0].mxu0 %vm928_vm2, %v913_v63  ;;  %v1052_v63 = vcombine.high %v1050_v57, %v1050_v57  ;;  %1796 = vst.msk [vmem:[%s663_s30] sm:$0xff] %vm1795_vm1, %v2190_v46 }
 0x142   : > { %v900_v2 = vmul.f32 1.442695, %v874_v60  ;;  %v2142_v4 = vpop.eup %2141  ;;  %v860_v5 = vmul.f32 -10.0, %v844_v62  ;;  %v824_v10 = vpop.permute.xlu0 %823 }
 0x143   : > { %v820_v11 = vpop.permute.xlu1 %819  ;;  %2151 = vpow2.f32 %v902_v1  ;;  %v877_v12 = vmul.f32 %v861_v3, %v845_v61  ;;  %v847_v13 = vsub.f32 %v824_v10, %v2363_v48  ;;  %v914_v16 = vpack.c.bf16 %v2140_v0, %v2142_v4  ;;  %v2436_v10 = vld [vmem:[%s2603_s11] ss:$0 sm:$0xff] }
 0x144   : > { %v846_v14 = vsub.f32 %v820_v11, %v2363_v48  ;;  %2153 = vpow2.f32 %v900_v2  ;;  %v876_v15 = vmul.f32 %v860_v5, %v844_v62  ;;  %v2430_v2 = vld [vmem:[%s2600_s8] sm:$0xff] }
 0x145   : > { %v2144_v17 = vpop.eup %2143  ;;  %v906_v18 = vmul.f32 1.442695, %v877_v12  ;;  %v863_v19 = vmul.f32 -10.0, %v847_v13  ;;  %2039 = vmatprep.mubr.msk.bf16.mxu0 %vm928_vm2, %v914_v16 }
 0x146   : > { %v862_v20 = vmul.f32 -10.0, %v846_v14  ;;  %v2146_v21 = vpop.eup %2145  ;;  %v904_v22 = vmul.f32 1.442695, %v876_v15 }
 0x147   : > { %2155 = vpow2.f32 %v906_v18  ;;  %v879_v23 = vmul.f32 %v863_v19, %v847_v13  ;;  %v915_v25 = vpack.c.bf16 %v2144_v17, %v2146_v21  ;;  %v2441_v13 = vld [vmem:[%s2600_s8 + $0x8] sm:$0xff] }
 0x148   : > { %v878_v24 = vmul.f32 %v862_v20, %v846_v14  ;;  %2157 = vpow2.f32 %v904_v22 }
 0x149   : > { %v2148_v26 = vpop.eup %2147  ;;  %v910_v28 = vmul.f32 1.442695, %v879_v23  ;;  %2040 = vmatmul.mubr.msk.bf16.gmra.mrb[4].mxu0 %vm928_vm2, %v915_v25 }
 0x14a   : > { %v908_v29 = vmul.f32 1.442695, %v878_v24  ;;  %v2150_v48 = vpop.eup %2149 }
 0x14b   : > { %2159 = vpow2.f32 %v910_v28  ;;  %v916_v30 = vpack.c.bf16 %v2148_v26, %v2150_v48 }
 0x14c   : > { %2161 = vpow2.f32 %v908_v29 }
 0x14d   : > { %v2152_v31 = vpop.eup %2151  ;;  %2043 = vmatprep.mubr.msk.bf16.mxu0 %vm928_vm2, %v916_v30 }
 0x14e   : > { %v2154_v32 = vpop.eup %2153 }
 0x14f   : > { %v917_v33 = vpack.c.bf16 %v2152_v31, %v2154_v32 }
 0x151   : > { %v2156_v34 = vpop.eup %2155  ;;  %2044 = vmatmul.mubr.msk.bf16.gmra.mrb[8].mxu0 %vm928_vm2, %v917_v33 }
 0x152   : > { %v2158_v37 = vpop.eup %2157 }
 0x153   : > { %v718_v38 = vpop.permute.xlu1 %717  ;;  %v918_v40 = vpack.c.bf16 %v2156_v34, %v2158_v37 }
 0x154   : > { %vm723_vm5 = vcmp.eq.s32.totalorder %v718_v38, %v1981_v35 }
 0x155   : > { %v2160_v42 = vpop.eup %2159  ;;  %vm727_vm7 = vmand %vm726_vm6, %vm723_vm5  ;;  %2047 = vmatprep.mubr.msk.bf16.mxu0 %vm928_vm2, %v918_v40 }
 0x156   : > { %v2162_v44 = vpop.eup %2161  ;;  %v1982_v47 = vsel %vm727_vm7, 1.0, %v2190_v46 }
 0x157   : > { %v919_v49 = vpack.c.bf16 %v2160_v42, %v2162_v44  ;;  %v1509_v50 = vrot.slane %v1982_v47, %v2310_v7  ;;  %v1682_v27 = vsel %vm928_vm2, %v1982_v47, 0.0  ;;  %v1520_v51 = vrot.slane %v1982_v47, %v2313_v8 }
 0x158   : > { %v1531_v52 = vrot.slane %v1982_v47, %v2316_v9  ;;  %v1542_v53 = vrot.slane %v1982_v47, %v772_v36  ;;  %v1553_v54 = vrot.slane %v1982_v47, %v783_v39  ;;  %v1564_v55 = vrot.slane %v1982_v47, %v794_v41  ;;  %v2125_v36 = vld [vmem:[%s2604_s12] sm:$0xff]   ;;  %v2126_v39 = vld [vmem:[%s2604_s12 + $0x8] sm:$0xff]  }
 0x159   : > { %1515 = vbcast.lane.b32.xlu1 %v1509_v50, 264  ;;  %1511 = vbcast.lane.b32.xlu0 %v1509_v50, 256  ;;  %v1575_v8 = vrot.slane %v1982_v47, %v805_v43  ;;  %v1586_v9 = vrot.slane %v1982_v47, %v816_v45  ;;  %v2191_v41 = vmov 1966171168  }
 0x15a   : > { %2048 = vmatmul.mubr.msk.bf16.gmra.mrb[12].mxu0 %vm928_vm2, %v919_v49  ;;  %2051 = vmatprep.subr.bf16.mxu1 %v2125_v36  ;;  %v1054_v43 = vunpack.c.l.s4 %v2191_v41 }
 0x15b   : > { %2052 = vmatpush3.bf16.msra.mxu1 %v2125_v36  ;;  %2079 = vmatprep.mubr.msk.f32.mxu0 %vm2193_vm9, %v2190_v46 }
 0x15c   : > { %2053 = vmatprep.subr.bf16.mxu1 %v2126_v39  ;;  %v1055_v56 = vunpack.c.0.s8 %v1054_v43 }
 0x15d   : > { %1526 = vbcast.lane.b32.xlu1 %v1520_v51, 264  ;;  %1522 = vbcast.lane.b32.xlu0 %v1520_v51, 256 }
 0x15e   : > { %v2420_v45 = vsub.s32 %v1055_v56, %v2307_v6 }
 0x15f   : > { %2054 = vmatpush3.bf16.msra.mxu1 %v2126_v39 }
 0x160   : > { %v1059_v58 = vrot.slane %v1050_v57, %v2420_v45  ;;  %v1066_v5 = vrot.slane %v1052_v63, %v2420_v45 }
 0x161   : > { %1537 = vbcast.lane.b32.xlu1 %v1531_v52, 264  ;;  %1533 = vbcast.lane.b32.xlu0 %v1531_v52, 256 }
 0x162   : > { %v1067_v59 = vcombine.high %v1059_v58, %v1059_v58  ;;  %v1075_v61 = vrot.slane %v1059_v58, %v2420_v45  ;;  %v1068_v23 = vcombine.high %v1066_v5, %v1066_v5  ;;  %v1082_v42 = vrot.slane %v1066_v5, %v2420_v45 }
 0x164   : > { %v1089_v60 = vrot.slane %v1067_v59, %v2420_v45  ;;  %v1104_v0 = vrot.slane %v1075_v61, %v2310_v7  ;;  %v1097_v14 = vcombine.high %v1075_v61, %v1075_v61  ;;  %v1096_v34 = vrot.slane %v1068_v23, %v2420_v45 }
 0x165   : > { %1548 = vbcast.lane.b32.xlu1 %v1542_v53, 264  ;;  %1544 = vbcast.lane.b32.xlu0 %v1542_v53, 256  ;;  %v1120_v36 = vrot.slane %v1082_v42, %v2310_v7 }
 0x166   : > { %v1108_v62 = vrot.slane %v1089_v60, %v2310_v7  ;;  %v1099_v4 = vcombine.high %v1089_v60, %v1089_v60  ;;  %v1112_v25 = vrot.slane %v1097_v14, %v2310_v7  ;;  %v1100_v60 = vcombine.high %v1096_v34, %v1096_v34 }
 0x168   : > { %v1116_v22 = vrot.slane %v1099_v4, %v2310_v7 }
 0x169   : > { %1559 = vbcast.lane.b32.xlu1 %v1553_v54, 264  ;;  %1555 = vbcast.lane.b32.xlu0 %v1553_v54, 256 }
 0x16d   : > { %1570 = vbcast.lane.b32.xlu1 %v1564_v55, 264  ;;  %1566 = vbcast.lane.b32.xlu0 %v1564_v55, 256  ;;  %v1124_v55 = vrot.slane %v1096_v34, %v2310_v7 }
 0x171   : > { %1581 = vbcast.lane.b32.xlu1 %v1575_v8, 264  ;;  %1577 = vbcast.lane.b32.xlu0 %v1575_v8, 256 }
 0x175   : > { %1592 = vbcast.lane.b32.xlu1 %v1586_v9, 264  ;;  %1588 = vbcast.lane.b32.xlu0 %v1586_v9, 256 }
 0x194   : > { %1683 = vadd.xlane.f32.xlu0 %v1682_v27 }
 0x214   : > { %v2037_v1 = vpop.f32.mrb[0].mxu0 }
 0x215   : > { %v1143_v6 = vadd.f32 %v2037_v1, %v1108_v62  ;;  %v987_v3 = vpop.f32.mrb[1].mxu0  ;;  %v1098_v1 = vcombine.high %v1082_v42, %v1082_v42 }
 0x216   : > { %v1141_v11 = vadd.f32 %v1104_v0, %v987_v3  ;;  %v2038_v12 = vpop.f32.mrb[2].mxu0 }
 0x217   : > { %v1161_v15 = vadd.f32 %v2430_v2, %v1143_v6  ;;  %v1144_v16 = vadd.f32 %v2038_v12, %v1108_v62  ;;  %v990_v17 = vpop.f32.mrb[3].mxu0 }
 0x218   : > { %v1159_v18 = vadd.f32 %v2430_v2, %v1141_v11  ;;  %v1142_v19 = vadd.f32 %v1104_v0, %v990_v17  ;;  %v1132_v17 = vrot.slane %v1100_v60, %v2310_v7 }
 0x219   : > { %v1184_v20 = vadd.f32 %v2436_v10, %v1161_v15  ;;  %v1162_v21 = vadd.f32 %v2441_v13, %v1144_v16 }
 0x21a   : > { %v1160_v24 = vadd.f32 %v2441_v13, %v1142_v19  ;;  %v1182_v26 = vadd.f32 %v2436_v10, %v1159_v18 }
 0x21b   : > { %v1185_v28 = vadd.f32 %v2436_v10, %v1162_v21  ;;  %v1200_v30 = vmax.f32 %v1184_v20, 0.0  ;;  %v1128_v20 = vrot.slane %v1098_v1, %v2310_v7 }
 0x21c   : > { %v2041_v29 = vpop.f32.mrb[4].mxu0  ;;  %v1183_v48 = vadd.f32 %v2436_v10, %v1160_v24  ;;  %v1198_v38 = vmax.f32 %v1182_v26, 0.0 }
 0x21d   : > { %v1201_v31 = vmax.f32 %v1185_v28, 0.0  ;;  %v1147_v32 = vadd.f32 %v2041_v29, %v1116_v22  ;;  %v1003_v33 = vpop.f32.mrb[5].mxu0 }
 0x21e   : > { %v1145_v35 = vadd.f32 %v1112_v25, %v1003_v33  ;;  %v2042_v37 = vpop.f32.mrb[6].mxu0  ;;  %v1199_v40 = vmax.f32 %v1183_v48, 0.0 }
 0x21f   : > { %v1215_v44 = vpack.c.bf16 %v1201_v31, %v1200_v30  ;;  %v1165_v47 = vadd.f32 %v2430_v2, %v1147_v32  ;;  %v1148_v49 = vadd.f32 %v2042_v37, %v1116_v22  ;;  %v1006_v50 = vpop.f32.mrb[7].mxu0 }
 0x220   : > { %v1163_v27 = vadd.f32 %v2430_v2, %v1145_v35  ;;  %v1146_v51 = vadd.f32 %v1112_v25, %v1006_v50  ;;  %v1214_v52 = vpack.c.bf16 %v1199_v40, %v1198_v38 }
 0x221   : > { %v1188_v53 = vadd.f32 %v2436_v10, %v1165_v47  ;;  %v1166_v54 = vadd.f32 %v2441_v13, %v1148_v49 }
 0x222   : > { %v1186_v8 = vadd.f32 %v2436_v10, %v1163_v27  ;;  %v1164_v9 = vadd.f32 %v2441_v13, %v1146_v51  ;;  %2055 = vmatprep.mubr.msk.bf16.mxu1 %vm1238_vm8, %v1214_v52 }
 0x223   : > { %v1189_v39 = vadd.f32 %v2436_v10, %v1166_v54  ;;  %2056 = vmatmul.mubr.msk.bf16.vlgmr.msra.gmra.mrb[0].mxu1 %vm1238_vm8, %v1215_v44  ;;  %v1204_v56 = vmax.f32 %v1188_v53, 0.0 }
 0x224   : > { %v1187_v41 = vadd.f32 %v2436_v10, %v1164_v9  ;;  %v2045_v43 = vpop.f32.mrb[8].mxu0  ;;  %v1202_v61 = vmax.f32 %v1186_v8, 0.0  ;;  %v1686_v8 = vld [vmem:[%s2606_s14 + $0x8] sm:$0xff] }
 0x225   : > { %v1205_v57 = vmax.f32 %v1189_v39, 0.0  ;;  %v1151_v58 = vadd.f32 %v2045_v43, %v1124_v55  ;;  %v1019_v59 = vpop.f32.mrb[9].mxu0  ;;  %v1688_v39 = vld [vmem:[%s2606_s14 + $0x18] sm:$0xff]  ;;  %v1360_v43 = vld [vmem:[%s643_s21] sm:$0xff] }
 0x226   : > { %v1203_v62 = vmax.f32 %v1187_v41, 0.0  ;;  %v1149_v63 = vadd.f32 %v1120_v36, %v1019_v59  ;;  %v2046_v0 = vpop.f32.mrb[10].mxu0  ;;  %v1516_v59 = vpop.permute.xlu1 %1515 }
 0x227   : > { %v1217_v6 = vpack.c.bf16 %v1205_v57, %v1204_v56  ;;  %v1169_v3 = vadd.f32 %v2430_v2, %v1151_v58  ;;  %v1152_v4 = vadd.f32 %v2046_v0, %v1124_v55  ;;  %v1022_v5 = vpop.f32.mrb[11].mxu0  ;;  %v1369_v56 = vrot.slane %v1360_v43, %v2420_v45  ;;  %v1512_v58 = vpop.permute.xlu0 %1511 }
 0x228   : > { %v1216_v11 = vpack.c.bf16 %v1203_v62, %v1202_v61  ;;  %v1167_v12 = vadd.f32 %v2430_v2, %v1149_v63  ;;  %v1150_v14 = vadd.f32 %v1120_v36, %v1022_v5  ;;  %v1687_v36 = vld [vmem:[%s2606_s14 + $0x10] sm:$0xff]  ;;  %v1362_v62 = vcombine.high %v1360_v43, %v1360_v43  ;;  %v2517_v5 = vld [vmem:[%s2605_s13] ss:$0 sm:$0xff] }
 0x229   : > { %v1192_v15 = vadd.f32 %v2436_v10, %v1169_v3  ;;  %v1170_v16 = vadd.f32 %v2441_v13, %v1152_v4  ;;  %v2086_v41 = vpack.c.bf16 %v1688_v39, %v1687_v36  ;;  %v1377_v57 = vcombine.high %v1369_v56, %v1369_v56 }
 0x22a   : > { %v1190_v18 = vadd.f32 %v2436_v10, %v1167_v12  ;;  %v1168_v19 = vadd.f32 %v2441_v13, %v1150_v14  ;;  %2059 = vmatprep.mubr.msk.bf16.mxu1 %vm1238_vm8, %v1216_v11  ;;  %v1385_v61 = vrot.slane %v1369_v56, %v2420_v45  ;;  %v1527_v1 = vpop.permute.xlu1 %1526  ;;  %v1376_v3 = vrot.slane %v1362_v62, %v2420_v45 }
 0x22b   : > { %v1193_v21 = vadd.f32 %v2436_v10, %v1170_v16  ;;  %2060 = vmatmul.mubr.msk.bf16.gmra.mrb[4].mxu1 %vm1238_vm8, %v1217_v6  ;;  %v1208_v24 = vmax.f32 %v1192_v15, 0.0  ;;  %v1399_v60 = vrot.slane %v1377_v57, %v2420_v45  ;;  %v1523_v63 = vpop.permute.xlu0 %1522 }
 0x22c   : > { %v1191_v22 = vadd.f32 %v2436_v10, %v1168_v19  ;;  %v1206_v29 = vmax.f32 %v1190_v18, 0.0  ;;  %v1414_v6 = vrot.slane %v1385_v61, %v2310_v7  ;;  %v1407_v18 = vcombine.high %v1385_v61, %v1385_v61 }
 0x22d   : > { %v2049_v23 = vpop.f32.mrb[12].mxu0  ;;  %v1209_v25 = vmax.f32 %v1193_v21, 0.0  ;;  %v1418_v0 = vrot.slane %v1399_v60, %v2310_v7  ;;  %v1409_v14 = vcombine.high %v1399_v60, %v1399_v60 }
 0x22e   : > { %v1155_v26 = vadd.f32 %v2049_v23, %v1132_v17  ;;  %v1035_v28 = vpop.f32.mrb[13].mxu0  ;;  %v1207_v48 = vmax.f32 %v1191_v22, 0.0  ;;  %v1378_v22 = vcombine.high %v1376_v3, %v1376_v3  ;;  %v2520_v23 = vpop.permute.xlu1 %1537 }
 0x22f   : > { %v1153_v30 = vadd.f32 %v1128_v20, %v1035_v28  ;;  %v2050_v31 = vpop.f32.mrb[14].mxu0  ;;  %v1219_v32 = vpack.c.bf16 %v1209_v25, %v1208_v24  ;;  %v1534_v15 = vpop.permute.xlu0 %1533 }
 0x230   : > { %v1173_v33 = vadd.f32 %v2430_v2, %v1155_v26  ;;  %v1156_v34 = vadd.f32 %v2050_v31, %v1132_v17  ;;  %v1038_v35 = vpop.f32.mrb[15].mxu0  ;;  %v1218_v37 = vpack.c.bf16 %v1207_v48, %v1206_v29  ;;  %v1426_v29 = vrot.slane %v1409_v14, %v2310_v7 }
 0x231   : > { %v1171_v38 = vadd.f32 %v2430_v2, %v1153_v30  ;;  %v1154_v40 = vadd.f32 %v1128_v20, %v1038_v35  ;;  %v1422_v31 = vrot.slane %v1407_v18, %v2310_v7 }
 0x232   : > { %v1196_v42 = vadd.f32 %v2436_v10, %v1173_v33  ;;  %v1174_v44 = vadd.f32 %v2441_v13, %v1156_v34  ;;  %2063 = vmatprep.mubr.msk.bf16.mxu1 %vm1238_vm8, %v1218_v37  ;;  %v1406_v34 = vrot.slane %v1378_v22, %v2420_v45 }
 0x233   : > { %v1194_v47 = vadd.f32 %v2436_v10, %v1171_v38  ;;  %v1172_v49 = vadd.f32 %v2441_v13, %v1154_v40  ;;  %2064 = vmatmul.mubr.msk.bf16.gmra.mrb[8].mxu1 %vm1238_vm8, %v1219_v32  ;;  %v1685_v13 = vld [vmem:[%s2606_s14] sm:$0xff]  ;;  %v1545_v35 = vpop.permute.xlu0 %1544 }
 0x234   : > { %v1197_v50 = vadd.f32 %v2436_v10, %v1174_v44  ;;  %v1212_v51 = vmax.f32 %v1196_v42, 0.0  ;;  %v2083_v9 = vpack.c.bf16 %v1686_v8, %v1685_v13  ;;  %v1392_v42 = vrot.slane %v1376_v3, %v2420_v45 }
 0x235   : > { %v1195_v27 = vadd.f32 %v2436_v10, %v1172_v49  ;;  %v1210_v2 = vmax.f32 %v1194_v47, 0.0  ;;  %v2192_v10 = vmov 0.0|0.0  }
 0x236   : > { %v1213_v52 = vmax.f32 %v1197_v50, 0.0  ;;  %2082 = vmatprep.subr.bf16.mxu0 %v2192_v10  ;;  %v1410_v50 = vcombine.high %v1406_v34, %v1406_v34 }
 0x237   : > { %v1211_v53 = vmax.f32 %v1195_v27, 0.0  ;;  %2084 = vmatpush3.bf16.msra.mxu0 %v2083_v9  ;;  %v1549_v27 = vpop.permute.xlu1 %1548 }
 0x238   : > { %v1221_v54 = vpack.c.bf16 %v1213_v52, %v1212_v51  ;;  %2085 = vmatprep.subr.bf16.mxu0 %v2192_v10  ;;  %v2540_v3 = vrot.slane %v1410_v50, %v2310_v7 }
 0x239   : > { %v1220_v55 = vpack.c.bf16 %v1211_v53, %v1210_v2 }
 0x23b   : > { %2067 = vmatprep.mubr.msk.bf16.mxu1 %vm1238_vm8, %v1220_v55  ;;  %2087 = vmatpush3.bf16.msra.mxu0 %v2086_v41 }
 0x23c   : > { %2068 = vmatmul.mubr.msk.bf16.gmra.mrb[12].mxu1 %vm1238_vm8, %v1221_v54  ;;  %v1408_v54 = vcombine.high %v1392_v42, %v1392_v42 }
 0x2f6   : > { %v2057_v4 = vpop.f32.mrb[0].mxu1 }
 0x2f7   : > { %v1453_v11 = vadd.f32 %v2057_v4, %v1418_v0  ;;  %v1297_v12 = vpop.f32.mrb[1].mxu1  ;;  %v2542_v4 = vpop.permute.xlu1 %1559 }
 0x2f8   : > { %v1451_v16 = vadd.f32 %v1414_v6, %v1297_v12  ;;  %v2058_v17 = vpop.f32.mrb[2].mxu1 }
 0x2f9   : > { %v1476_v19 = vadd.f32 %v2517_v5, %v1453_v11  ;;  %v1454_v20 = vadd.f32 %v2058_v17, %v1418_v0  ;;  %v1300_v21 = vpop.f32.mrb[3].mxu1  ;;  %v2545_v17 = vrot.slane %v1408_v54, %v2310_v7 }
 0x2fa   : > { %v1474_v24 = vadd.f32 %v2517_v5, %v1451_v16  ;;  %v1452_v25 = vadd.f32 %v1414_v6, %v1300_v21 }
 0x2fb   : > { %v1492_v26 = vmax.f32 %v1476_v19, 0.0  ;;  %v1477_v28 = vadd.f32 %v2517_v5, %v1454_v20 }
 0x2fc   : > { %v1490_v48 = vmax.f32 %v1474_v24, 0.0  ;;  %v1475_v30 = vadd.f32 %v2517_v5, %v1452_v25 }
 0x2fd   : > { %v1596_v32 = vmul.f32 %v1523_v63, %v1492_v26  ;;  %v1493_v33 = vmax.f32 %v1477_v28, 0.0  ;;  %v1430_v63 = vrot.slane %v1392_v42, %v2310_v7 }
 0x2fe   : > { %v1594_v37 = vmul.f32 %v1512_v58, %v1490_v48  ;;  %v1491_v38 = vmax.f32 %v1475_v30, 0.0  ;;  %v2061_v40 = vpop.f32.mrb[4].mxu1  ;;  %v1434_v58 = vrot.slane %v1406_v34, %v2310_v7 }
 0x2ff   : > { %v1597_v44 = vmul.f32 %v1527_v1, %v1493_v33  ;;  %v1457_v47 = vadd.f32 %v2061_v40, %v1426_v29  ;;  %v1313_v49 = vpop.f32.mrb[5].mxu1  ;;  %v1619_v51 = vsel %vm1238_vm8, %v1596_v32, 0.0 }
 0x300   : > { %v1595_v52 = vmul.f32 %v1516_v59, %v1491_v38  ;;  %v1455_v2 = vadd.f32 %v1422_v31, %v1313_v49  ;;  %v2062_v53 = vpop.f32.mrb[6].mxu1  ;;  %v1610_v55 = vsel %vm1238_vm8, %v1594_v37, 0.0  ;;  %v1556_v59 = vpop.permute.xlu0 %1555 }
 0x301   : > { %v1620_v13 = vsel %vm1238_vm8, %v1597_v44, 0.0  ;;  %v1480_v8 = vadd.f32 %v2517_v5, %v1457_v47  ;;  %v1458_v10 = vadd.f32 %v2062_v53, %v1426_v29  ;;  %v1316_v9 = vpop.f32.mrb[7].mxu1  ;;  %v1571_v44 = vpop.permute.xlu1 %1570 }
 0x302   : > { %v1621_v45 = vadd.f32 %v1620_v13, %v1619_v51  ;;  %v1611_v36 = vsel %vm1238_vm8, %v1595_v52, 0.0  ;;  %v1478_v39 = vadd.f32 %v2517_v5, %v1455_v2  ;;  %v1456_v41 = vadd.f32 %v1422_v31, %v1316_v9 }
 0x303   : > { %v1612_v43 = vadd.f32 %v1611_v36, %v1610_v55  ;;  %v1496_v56 = vmax.f32 %v1480_v8, 0.0  ;;  %v1481_v57 = vadd.f32 %v2517_v5, %v1458_v10 }
 0x304   : > { %v1622_v60 = vrot.slane %v1621_v45, 4  ;;  %v1494_v61 = vmax.f32 %v1478_v39, 0.0  ;;  %v1479_v62 = vadd.f32 %v2517_v5, %v1456_v41  ;;  %v1567_v32 = vpop.permute.xlu0 %1566 }
 0x305   : > { %v1613_v0 = vrot.slane %v1612_v43, 4  ;;  %v1600_v1 = vmul.f32 %v1545_v35, %v1496_v56  ;;  %v1497_v6 = vmax.f32 %v1481_v57, 0.0 }
 0x306   : > { %v1623_v11 = vadd.f32 %v1622_v60, %v1621_v45  ;;  %v1598_v12 = vmul.f32 %v1534_v15, %v1494_v61  ;;  %v1495_v14 = vmax.f32 %v1479_v62, 0.0  ;;  %v2065_v16 = vpop.f32.mrb[8].mxu1 }
 0x307   : > { %v1614_v18 = vadd.f32 %v1613_v0, %v1612_v43  ;;  %v1637_v19 = vsel %vm1238_vm8, %v1600_v1, 0.0  ;;  %v1601_v20 = vmul.f32 %v1549_v27, %v1497_v6  ;;  %v1461_v21 = vadd.f32 %v2065_v16, %v1434_v58  ;;  %v1329_v22 = vpop.f32.mrb[9].mxu1  ;;  %v1582_v6 = vpop.permute.xlu1 %1581 }
 0x308   : > { %v1624_v24 = vrot.slane %v1623_v11, 2  ;;  %v1628_v25 = vsel %vm1238_vm8, %v1598_v12, 0.0  ;;  %v1599_v26 = vmul.f32 %v2520_v23, %v1495_v14  ;;  %v1459_v28 = vadd.f32 %v1430_v63, %v1329_v22  ;;  %v2066_v29 = vpop.f32.mrb[10].mxu1  ;;  %v1578_v43 = vpop.permute.xlu0 %1577 }
 0x309   : > { %v1615_v48 = vrot.slane %v1614_v18, 2  ;;  %v1638_v15 = vsel %vm1238_vm8, %v1601_v20, 0.0  ;;  %v1484_v30 = vadd.f32 %v2517_v5, %v1461_v21  ;;  %v1462_v7 = vadd.f32 %v2066_v29, %v1434_v58  ;;  %v1332_v31 = vpop.f32.mrb[11].mxu1 }
 0x30a   : > { %v1625_v33 = vadd.f32 %v1624_v24, %v1623_v11  ;;  %v1639_v34 = vadd.f32 %v1638_v15, %v1637_v19  ;;  %v1629_v35 = vsel %vm1238_vm8, %v1599_v26, 0.0  ;;  %v1482_v37 = vadd.f32 %v2517_v5, %v1459_v28 }
 0x30b   : > { %v1616_v38 = vadd.f32 %v1615_v48, %v1614_v18  ;;  %v1630_v40 = vadd.f32 %v1629_v35, %v1628_v25  ;;  %v1500_v42 = vmax.f32 %v1484_v30, 0.0  ;;  %v1485_v23 = vadd.f32 %v2517_v5, %v1462_v7 }
 0x30c   : > { %v1626_v47 = vrot.slane %v1625_v33, 1  ;;  %v1640_v49 = vrot.slane %v1639_v34, 4  ;;  %v1498_v50 = vmax.f32 %v1482_v37, 0.0  ;;  %v1460_v27 = vadd.f32 %v1430_v63, %v1332_v31 }
 0x30d   : > { %v1617_v51 = vrot.slane %v1616_v38, 1  ;;  %v1631_v52 = vrot.slane %v1630_v40, 4  ;;  %v1604_v2 = vmul.f32 %v1567_v32, %v1500_v42  ;;  %v1501_v53 = vmax.f32 %v1485_v23, 0.0 }
 0x30e   : > { %v1627_v54 = vadd.f32 %v1626_v47, %v1625_v33  ;;  %v1641_v55 = vadd.f32 %v1640_v49, %v1639_v34  ;;  %v1602_v13 = vmul.f32 %v1556_v59, %v1498_v50  ;;  %v1483_v8 = vadd.f32 %v2517_v5, %v1460_v27  ;;  %v1593_v33 = vpop.permute.xlu1 %1592 }
 0x30f   : > { %v2069_v10 = vpop.f32.mrb[12].mxu1  ;;  %v1618_v9 = vadd.f32 %v1617_v51, %v1616_v38  ;;  %v1632_v45 = vadd.f32 %v1631_v52, %v1630_v40  ;;  %v1655_v36 = vsel %vm1238_vm8, %v1604_v2, 0.0  ;;  %v1605_v39 = vmul.f32 %v1571_v44, %v1501_v53 }
 0x310   : > { %v1345_v41 = vpop.f32.mrb[13].mxu1  ;;  %v1642_v56 = vrot.slane %v1641_v55, 2  ;;  %v1646_v57 = vsel %vm1238_vm8, %v1602_v13, 0.0  ;;  %v1499_v58 = vmax.f32 %v1483_v8, 0.0  ;;  %v1465_v60 = vadd.f32 %v2069_v10, %v2540_v3 }
 0x311   : > { %v2070_v61 = vpop.f32.mrb[14].mxu1  ;;  %v1706_v62 = vsel %vm1705_vm10, %v1627_v54, %v1618_v9  ;;  %v1633_v59 = vrot.slane %v1632_v45, 2  ;;  %v1656_v63 = vsel %vm1238_vm8, %v1605_v39, 0.0  ;;  %v1463_v0 = vadd.f32 %v2545_v17, %v1345_v41 }
 0x312   : > { %v1348_v1 = vpop.f32.mrb[15].mxu1  ;;  %v1643_v11 = vadd.f32 %v1642_v56, %v1641_v55  ;;  %v1657_v12 = vadd.f32 %v1656_v63, %v1655_v36  ;;  %v1603_v14 = vmul.f32 %v2542_v4, %v1499_v58  ;;  %v1488_v16 = vadd.f32 %v2517_v5, %v1465_v60  ;;  %v1589_v4 = vpop.permute.xlu0 %1588 }
 0x313   : > { %v1634_v18 = vadd.f32 %v1633_v59, %v1632_v45  ;;  %v1486_v19 = vadd.f32 %v2517_v5, %v1463_v0  ;;  %v1466_v20 = vadd.f32 %v2070_v61, %v2540_v3  ;;  %v1464_v21 = vadd.f32 %v2545_v17, %v1348_v1 }
 0x314   : > { %v1644_v22 = vrot.slane %v1643_v11, 1  ;;  %v1658_v24 = vrot.slane %v1657_v12, 4  ;;  %v1647_v25 = vsel %vm1238_vm8, %v1603_v14, 0.0  ;;  %v1504_v26 = vmax.f32 %v1488_v16, 0.0  ;;  %v1797_v16 = vld [vmem:[%s663_s30] sm:$0xff] }
 0x315   : > { %v1635_v28 = vrot.slane %v1634_v18, 1  ;;  %v1648_v29 = vadd.f32 %v1647_v25, %v1646_v57  ;;  %v1502_v48 = vmax.f32 %v1486_v19, 0.0  ;;  %v1489_v15 = vadd.f32 %v2517_v5, %v1466_v20 }
 0x316   : > { %v1659_v30 = vadd.f32 %v1658_v24, %v1657_v12  ;;  %v1487_v7 = vadd.f32 %v2517_v5, %v1464_v21  ;;  %v1608_v32 = vmul.f32 %v1589_v4, %v1504_v26  ;;  %v1645_v34 = vadd.f32 %v1644_v22, %v1643_v11  ;;  %v1684_v11 = vpop.xlane.xlu0 %1683 }
 0x317   : > { %v1636_v31 = vadd.f32 %v1635_v28, %v1634_v18  ;;  %v1649_v3 = vrot.slane %v1648_v29, 4  ;;  %v1505_v17 = vmax.f32 %v1489_v15, 0.0  ;;  %v1606_v37 = vmul.f32 %v1578_v43, %v1502_v48 }
 0x318   : > { %v1660_v35 = vrot.slane %v1659_v30, 2  ;;  %v1503_v38 = vmax.f32 %v1487_v7, 0.0  ;;  %v1673_v27 = vsel %vm1238_vm8, %v1608_v32, 0.0 }
 0x319   : > { %v1708_v40 = vsel %vm1707_vm11, %v1636_v31, %v1706_v62  ;;  %v1650_v42 = vadd.f32 %v1649_v3, %v1648_v29  ;;  %v1609_v23 = vmul.f32 %v1593_v33, %v1505_v17  ;;  %v1664_v51 = vsel %vm1238_vm8, %v1606_v37, 0.0 }
 0x31a   : > { %v1661_v44 = vadd.f32 %v1660_v35, %v1659_v30  ;;  %v1607_v47 = vmul.f32 %v1582_v6, %v1503_v38  ;;  %v1710_v49 = vsel %vm1709_vm12, %v1645_v34, %v1708_v40  ;;  %v2005_v6 = vld [vmem:[%s2607_s15] ss:$0 sm:$0xff] }
 0x31b   : > { %v1651_v50 = vrot.slane %v1650_v42, 2  ;;  %v1674_v5 = vsel %vm1238_vm8, %v1609_v23, 0.0  ;;  %v1696_v12 = vmul.f32 %v2005_v6, %v1684_v11 }
 0x31c   : > { %v1675_v52 = vadd.f32 %v1674_v5, %v1673_v27  ;;  %v1665_v2 = vsel %vm1238_vm8, %v1607_v47, 0.0  ;;  %v1662_v55 = vrot.slane %v1661_v44, 1 }
 0x31d   : > { %v1652_v53 = vadd.f32 %v1651_v50, %v1650_v42  ;;  %v1666_v54 = vadd.f32 %v1665_v2, %v1664_v51 }
 0x31e   : > { %v1676_v13 = vrot.slane %v1675_v52, 4  ;;  %v1663_v39 = vadd.f32 %v1662_v55, %v1661_v44 }
 0x31f   : > { %v1653_v8 = vrot.slane %v1652_v53, 1  ;;  %v1667_v10 = vrot.slane %v1666_v54, 4 }
 0x320   : > { %v1677_v9 = vadd.f32 %v1676_v13, %v1675_v52 }
 0x321   : > { %v1654_v45 = vadd.f32 %v1653_v8, %v1652_v53  ;;  %v1668_v36 = vadd.f32 %v1667_v10, %v1666_v54 }
 0x322   : > { %v1678_v41 = vrot.slane %v1677_v9, 2 }
 0x323   : > { %v1669_v43 = vrot.slane %v1668_v36, 2  ;;  %v1712_v56 = vsel %vm1711_vm13, %v1654_v45, %v1710_v49 }
 0x324   : > { %v1679_v57 = vadd.f32 %v1678_v41, %v1677_v9  ;;  %v1714_v58 = vsel %vm1713_vm14, %v1663_v39, %v1712_v56 }
 0x325   : > { %v1670_v60 = vadd.f32 %v1669_v43, %v1668_v36 }
 0x326   : > { %v1680_v61 = vrot.slane %v1679_v57, 1 }
 0x327   : > { %v1671_v62 = vrot.slane %v1670_v60, 1 }
 0x328   : > { %v1681_v63 = vadd.f32 %v1680_v61, %v1679_v57 }
 0x329   : > { %v1672_v59 = vadd.f32 %v1671_v62, %v1670_v60 }
 0x32b   : > { %v1716_v0 = vsel %vm1715_vm15, %v1672_v59, %v1714_v58 }
 0x32c   : > { %v1718_v1 = vsel %vm1717_vm0, %v1681_v63, %v1716_v0 }
 0x32d   : > { %2080 = vmatmul.mubr.msk.f32.vlgmr.msra.gmra.mrb[16].mxu0 %vm1238_vm8, %v1718_v1 }
 0x400   : > { %v1787_v14 = vpop.f32.mrb[16].mxu0 }
 0x401   : > { %v1788_v18 = vadd.f32 %v1787_v14, %v1696_v12  ;;  %v2081_v19 = vpop.f32.mrb[17].mxu0 }
 0x403   : > { %v1798_v20 = vadd.f32 %v1797_v16, %v1788_v18 }
 0x405   : > { %1800 = vst.msk [vmem:[%s663_s30] sm:$0xff] %vm1795_vm1, %v1798_v20 }
 0x406 PF: > { %s26_s23 = sadd.s32 1, %s2185_s23   ;;  %s2611_s21 = smov %s2181_s22 }
 0x407   : > { %p23_p5 = scmp.ge.s32.totalorder %s26_s23, 4   ;;  %s2612_s22 = smov %s2614_s24 }
 0x409   :  { %25 = sbr.rel (!%p23_p5) target bundleno = 2 (0x2), region = 142 }

</bundles_post_ra>
